<compile_context>
chip_gen: v7x
topology: tpu7x:2x2x1
jax: 0.10.0
libtpu: 0.0.40
codegen_flags: <defaults>
</compile_context>

<pallas_src>
import jax
import jax.numpy as jnp
from jax.experimental import pallas as pl
from jax.experimental.pallas import tpu as pltpu


def _conv_bn_relu_kernel(x_ref, w_ref, shift_ref, o_ref):
    # x_ref    : (tile_h + 2, (W+2)*Cin)  padded input row-slab incl. 2-row halo (compute dtype)
    # w_ref    : (3, (W+2)*Cin, W*Cout)   row-Toeplitz conv weights, BN scale folded in
    # shift_ref: (1, W*Cout)              folded BN shift (f32)
    # o_ref    : (tile_h, W*Cout)         lane-dense output slab (f32)
    tile_h = o_ref.shape[0]
    xt = x_ref[...]                                   # single load of the whole slab
    acc = jnp.zeros(o_ref.shape, jnp.float32)
    for dy in range(w_ref.shape[0]):                  # 3 H-taps -> 3 fat MXU matmuls
        acc += jnp.dot(xt[dy:dy + tile_h, :], w_ref[dy],
                       preferred_element_type=jnp.float32)
    y = jnp.maximum(acc + shift_ref[0], 0.0)          # folded BN shift + ReLU (f32 epilogue)
    o_ref[...] = y.astype(o_ref.dtype)


def _build_row_toeplitz(w_hwio, W):
    """Build per-dy matrices T[dy] of shape ((W+2)*Cin, W*Cout) such that
    (padded input row) @ T[dy] gives the dy-tap contribution of the 3x3 conv for a
    full output row (lane-dense layout [ow, cout])."""
    kH, kW, Cin, Cout = w_hwio.shape
    Wp = W + kW - 1
    x = jnp.arange(Wp)
    ow = jnp.arange(W)
    T = jnp.zeros((kH, Wp, Cin, W, Cout), w_hwio.dtype)
    for dx in range(kW):
        mask = (x[:, None] == ow[None, :] + dx).astype(w_hwio.dtype)       # (Wp, W)
        T = T + mask[None, :, None, :, None] * w_hwio[:, dx][:, None, :, None, :]
    return T.reshape(kH, Wp * Cin, W * Cout)


def _pick_tile_h(H, max_rows=128):
    t = min(H, max_rows)
    while H % t:
        t -= 1
    return t


def pointwise_conv_forward(x_nchw, w_oihw, gamma, beta, run_mean, run_var,
                           eps=1e-5, *, compute_dtype=jnp.bfloat16, tile_h=None):
    """Forward pass matching the PyTorch module (inference-mode BatchNorm).

    x_nchw : (N, Cin, H, W) f32;  w_oihw : (Cout, Cin, 3, 3) f32  ->  (N, Cout, H, W) f32
    """
    N, Cin, H, W = x_nchw.shape
    Cout, Cin2, kH, kW = w_oihw.shape
    assert (Cin2, kH, kW) == (Cin, 3, 3), "kernel implements the module defaults k=3, s=1, p=1"
    Wp = W + 2
    if tile_h is None:
        tile_h = _pick_tile_h(H)
    assert H % tile_h == 0
    nH = H // tile_h

    # ---- fold BatchNorm (inference) into the conv weights ----
    scale = (gamma / jnp.sqrt(run_var + eps)).astype(jnp.float32)           # (Cout,)
    shift = (beta - run_mean * scale).astype(jnp.float32)                   # (Cout,)
    w_hwio = jnp.transpose(w_oihw, (2, 3, 1, 0)).astype(jnp.float32) * scale  # (3,3,Cin,Cout)
    w_rows = _build_row_toeplitz(w_hwio, W).astype(compute_dtype)           # (3, Wp*Cin, W*Cout)
    shift_row = jnp.tile(shift, W).reshape(1, W * Cout).astype(jnp.float32)  # (1, W*Cout)

    # ---- input: NCHW -> padded NHWC row slabs, H-tiled with a 2-row halo ----
    x_nhwc = jnp.transpose(x_nchw, (0, 2, 3, 1))
    x_pad = jnp.pad(x_nhwc, ((0, 0), (1, 1), (1, 1), (0, 0)))
    x_rows = x_pad.reshape(N, H + 2, Wp * Cin)
    row_idx = jnp.arange(nH)[:, None] * tile_h + jnp.arange(tile_h + 2)[None, :]
    x_tiles = x_rows[:, row_idx, :].astype(compute_dtype)   # (N, nH, tile_h+2, Wp*Cin)
    # XLA fuses transpose+pad+gather+cast into one pass producing the bf16 tile array.
    # TODO(synk): if the surrounding model is NHWC the input/output transposes can be
    # dropped; for Cin/Cout >= 128 a channels-on-lanes NHWC matmul path would be
    # preferable to the row-Toeplitz weights (which scale quadratically with W).

    # ---- explicit VMEM budget for the chosen tile sizes (v7x has only 64 MiB) ----
    csz = jnp.dtype(compute_dtype).itemsize
    vmem_est = (2 * (tile_h + 2) * Wp * Cin * csz        # double-buffered input slab
                + 2 * tile_h * W * Cout * 4              # double-buffered output slab
                + 2 * 3 * Wp * Cin * W * Cout * csz      # resident Toeplitz weights
                + 2 * W * Cout * 4)                      # BN shift
    vmem_limit = int(min(max(4 * vmem_est, 4 << 20), 64 << 20))

    out_slab = pl.pallas_call(
        _conv_bn_relu_kernel,
        out_shape=jax.ShapeDtypeStruct((N, nH, tile_h, W * Cout), jnp.float32),
        grid_spec=pltpu.PrefetchScalarGridSpec(
            num_scalar_prefetch=0,
            grid=(N, nH),
            in_specs=[
                # input row-slab (leading batch / H-tile dims squeezed out)
                pl.BlockSpec((None, None, tile_h + 2, Wp * Cin),
                             lambda n, t: (n, t, 0, 0)),
                # weights + shift: constant index maps -> stay resident in VMEM
                pl.BlockSpec((3, Wp * Cin, W * Cout), lambda n, t: (0, 0, 0)),
                pl.BlockSpec((1, W * Cout), lambda n, t: (0, 0)),
            ],
            out_specs=pl.BlockSpec((None, None, tile_h, W * Cout),
                                   lambda n, t: (n, t, 0, 0)),
        ),
        compiler_params=pltpu.CompilerParams(
            dimension_semantics=("parallel", "parallel"),
            vmem_limit_bytes=vmem_limit),
    )(x_tiles, w_rows, shift_row)

    out_nhwc = out_slab.reshape(N, H, W, Cout)
    return jnp.transpose(out_nhwc, (0, 3, 1, 2))         # back to NCHW


# ---------------------------- references for testing ----------------------------

def _reference(x_nchw, w_oihw, gamma, beta, run_mean, run_var, eps=1e-5):
    y = jax.lax.conv_general_dilated(
        x_nchw, w_oihw, window_strides=(1, 1), padding=((1, 1), (1, 1)),
        dimension_numbers=("NCHW", "OIHW", "NCHW"))
    scale = (gamma / jnp.sqrt(run_var + eps)).reshape(1, -1, 1, 1)
    shift = (beta - run_mean * gamma / jnp.sqrt(run_var + eps)).reshape(1, -1, 1, 1)
    return jnp.maximum(y * scale + shift, 0.0)


def _reference_quantized(x_nchw, w_oihw, gamma, beta, run_mean, run_var,
                         eps=1e-5, compute_dtype=jnp.bfloat16):
    """Reference using the same bf16-quantized operands as the kernel (f32 accumulate)."""
    scale = gamma / jnp.sqrt(run_var + eps)
    shift = (beta - run_mean * scale).reshape(1, -1, 1, 1)
    w_q = (w_oihw * scale[:, None, None, None]).astype(compute_dtype).astype(jnp.float32)
    x_q = x_nchw.astype(compute_dtype).astype(jnp.float32)
    y = jax.lax.conv_general_dilated(
        x_q, w_q, window_strides=(1, 1), padding=((1, 1), (1, 1)),
        dimension_numbers=("NCHW", "OIHW", "NCHW"))
    return jnp.maximum(y + shift, 0.0)


if __name__ == "__main__":
    key = jax.random.PRNGKey(0)
    k1, k2, k3, k4, k5, k6 = jax.random.split(key, 6)

    N, Cin, Cout, H, W = 2, 4, 8, 16, 16

    x = jax.random.normal(k1, (N, Cin, H, W), dtype=jnp.float32)
    w = jax.random.normal(k2, (Cout, Cin, 3, 3), dtype=jnp.float32) * 0.1
    gamma = 1.0 + 0.1 * jax.random.normal(k3, (Cout,), dtype=jnp.float32)
    beta = 0.1 * jax.random.normal(k4, (Cout,), dtype=jnp.float32)
    run_mean = 0.1 * jax.random.normal(k5, (Cout,), dtype=jnp.float32)
    run_var = jnp.abs(1.0 + 0.1 * jax.random.normal(k6, (Cout,), dtype=jnp.float32))

    ref = _reference(x, w, gamma, beta, run_mean, run_var)

    # 1) f32 compute path: bit-accurate against the f32 reference.
    out_f32 = pointwise_conv_forward(x, w, gamma, beta, run_mean, run_var,
                                     compute_dtype=jnp.float32)
    out_f32 = jax.block_until_ready(out_f32)
    assert out_f32.shape == (N, Cout, H, W)
    assert jnp.allclose(out_f32, ref, atol=1e-4, rtol=1e-4)

    # 2) default bf16-operand path: matches a bf16-quantized reference tightly and the
    #    f32 reference within bf16 operand precision.
    out_bf16 = pointwise_conv_forward(x, w, gamma, beta, run_mean, run_var)
    out_bf16 = jax.block_until_ready(out_bf16)
    ref_q = _reference_quantized(x, w, gamma, beta, run_mean, run_var)
    assert jnp.allclose(out_bf16, ref_q, atol=2e-3, rtol=2e-3)
    assert jnp.allclose(out_bf16, ref, atol=5e-2, rtol=5e-2)

    # 3) spatially tiled path (nH > 1) exercising the H-halo logic.
    H2 = 32
    x2 = jax.random.normal(k1, (N, Cin, H2, W), dtype=jnp.float32)
    out2 = pointwise_conv_forward(x2, w, gamma, beta, run_mean, run_var,
                                  compute_dtype=jnp.float32, tile_h=8)
    out2 = jax.block_until_ready(out2)
    ref2 = _reference(x2, w, gamma, beta, run_mean, run_var)
    assert jnp.allclose(out2, ref2, atol=1e-4, rtol=1e-4)

    print("KERNEL_OK")
</pallas_src>

<mosaic_0001>
module attributes {stable_mosaic.version = 11 : i64} {
  func.func @_conv_bn_relu_kernel(%arg0: i32, %arg1: i32, %arg2: memref<1x1x18x72xf32, #tpu.memory_space<vmem>>, %arg3: memref<3x72x128xf32, #tpu.memory_space<vmem>>, %arg4: memref<1x128xf32, #tpu.memory_space<vmem>>, %arg5: memref<1x1x16x128xf32, #tpu.memory_space<vmem>>) attributes {dimension_semantics = [#tpu.dimension_semantics<parallel>, #tpu.dimension_semantics<parallel>], iteration_bounds = array<i64: 2, 1>, scalar_prefetch = 0 : i64, scratch_operands = 0 : i64, tpu.core_type = #tpu.core_type<tc>, window_params = [{transform_indices = @transform_0, window_bounds = array<i64: 1, 1, 18, 72>}, {pipeline_mode = #tpu.pipeline_mode<synchronous>, transform_indices = @transform_1, window_bounds = array<i64: 3, 72, 128>}, {pipeline_mode = #tpu.pipeline_mode<synchronous>, transform_indices = @transform_2, window_bounds = array<i64: 1, 128>}, {transform_indices = @transform_3, window_bounds = array<i64: 1, 1, 16, 128>}]} {
    %c0 = arith.constant 0 : index
    %c0_0 = arith.constant 0 : index
    %c0_1 = arith.constant 0 : index
    %c0_2 = arith.constant 0 : index
    %0 = vector.load %arg2[%c0, %c0_0, %c0_1, %c0_2] : memref<1x1x18x72xf32, #tpu.memory_space<vmem>>, vector<1x1x18x72xf32>
    %1 = vector.shape_cast %0 : vector<1x1x18x72xf32> to vector<18x72xf32>
    %cst = arith.constant 0.000000e+00 : f32
    %2 = vector.broadcast %cst : f32 to vector<16x128xf32>
    %3 = vector.extract_strided_slice %1 {offsets = [0, 0], sizes = [16, 72], strides = [1, 1]} : vector<18x72xf32> to vector<16x72xf32>
    %c0_3 = arith.constant 0 : index
    %c0_4 = arith.constant 0 : index
    %c0_5 = arith.constant 0 : index
    %4 = vector.load %arg3[%c0_3, %c0_4, %c0_5] : memref<3x72x128xf32, #tpu.memory_space<vmem>>, vector<1x72x128xf32>
    %5 = vector.shape_cast %4 : vector<1x72x128xf32> to vector<72x128xf32>
    %cst_6 = arith.constant dense<0.000000e+00> : vector<16x128xf32>
    %6 = tpu.matmul %3, %5, %cst_6 {dimension_numbers = #tpu.dot_dimension_numbers<[1], [0], [0], [1], [0, 0, 1, 1], [], []>} : vector<16x72xf32>, vector<72x128xf32>, vector<16x128xf32> -> vector<16x128xf32>
    %7 = arith.addf %2, %6 : vector<16x128xf32>
    %8 = vector.extract_strided_slice %1 {offsets = [1, 0], sizes = [16, 72], strides = [1, 1]} : vector<18x72xf32> to vector<16x72xf32>
    %c1 = arith.constant 1 : index
    %c0_7 = arith.constant 0 : index
    %c0_8 = arith.constant 0 : index
    %9 = vector.load %arg3[%c1, %c0_7, %c0_8] : memref<3x72x128xf32, #tpu.memory_space<vmem>>, vector<1x72x128xf32>
    %10 = vector.shape_cast %9 : vector<1x72x128xf32> to vector<72x128xf32>
    %cst_9 = arith.constant dense<0.000000e+00> : vector<16x128xf32>
    %11 = tpu.matmul %8, %10, %cst_9 {dimension_numbers = #tpu.dot_dimension_numbers<[1], [0], [0], [1], [0, 0, 1, 1], [], []>} : vector<16x72xf32>, vector<72x128xf32>, vector<16x128xf32> -> vector<16x128xf32>
    %12 = arith.addf %7, %11 : vector<16x128xf32>
    %13 = vector.extract_strided_slice %1 {offsets = [2, 0], sizes = [16, 72], strides = [1, 1]} : vector<18x72xf32> to vector<16x72xf32>
    %c2 = arith.constant 2 : index
    %c0_10 = arith.constant 0 : index
    %c0_11 = arith.constant 0 : index
    %14 = vector.load %arg3[%c2, %c0_10, %c0_11] : memref<3x72x128xf32, #tpu.memory_space<vmem>>, vector<1x72x128xf32>
    %15 = vector.shape_cast %14 : vector<1x72x128xf32> to vector<72x128xf32>
    %cst_12 = arith.constant dense<0.000000e+00> : vector<16x128xf32>
    %16 = tpu.matmul %13, %15, %cst_12 {dimension_numbers = #tpu.dot_dimension_numbers<[1], [0], [0], [1], [0, 0, 1, 1], [], []>} : vector<16x72xf32>, vector<72x128xf32>, vector<16x128xf32> -> vector<16x128xf32>
    %17 = arith.addf %12, %16 : vector<16x128xf32>
    %c0_13 = arith.constant 0 : index
    %c0_14 = arith.constant 0 : index
    %18 = vector.load %arg4[%c0_13, %c0_14] : memref<1x128xf32, #tpu.memory_space<vmem>>, vector<1x128xf32>
    %19 = vector.shape_cast %18 : vector<1x128xf32> to vector<128xf32>
    %20 = vector.shape_cast %19 : vector<128xf32> to vector<1x128xf32>
    %21 = vector.broadcast %20 : vector<1x128xf32> to vector<16x128xf32>
    %22 = arith.addf %17, %21 : vector<16x128xf32>
    %cst_15 = arith.constant 0.000000e+00 : f32
    %23 = vector.broadcast %cst_15 : f32 to vector<16x128xf32>
    %24 = arith.maximumf %22, %23 : vector<16x128xf32>
    %c0_16 = arith.constant 0 : index
    %c0_17 = arith.constant 0 : index
    %c0_18 = arith.constant 0 : index
    %c0_19 = arith.constant 0 : index
    %25 = vector.load %arg5[%c0_16, %c0_17, %c0_18, %c0_19] : memref<1x1x16x128xf32, #tpu.memory_space<vmem>>, vector<1x1x16x128xf32>
    %26 = vector.shape_cast %25 : vector<1x1x16x128xf32> to vector<16x128xf32>
    %27 = vector.shape_cast %24 : vector<16x128xf32> to vector<1x1x16x128xf32>
    tpu.vector_store %arg5[%c0_16, %c0_17, %c0_18, %c0_19], %27 {strides = array<i32>} : memref<1x1x16x128xf32, #tpu.memory_space<vmem>>, vector<1x1x16x128xf32>,
    return
  }
  func.func @transform_0(%arg0: i32, %arg1: i32) -> (i32, i32, i32, i32) {
    %c0_i32 = arith.constant 0 : i32
    %c0_i32_0 = arith.constant 0 : i32
    %c0_i32_1 = arith.constant 0 : i32
    return %arg0, %arg1, %c0_i32, %c0_i32_0 : i32, i32, i32, i32
  }
  func.func @transform_1(%arg0: i32, %arg1: i32) -> (i32, i32, i32) {
    %c0_i32 = arith.constant 0 : i32
    %c0_i32_0 = arith.constant 0 : i32
    %c0_i32_1 = arith.constant 0 : i32
    %c0_i32_2 = arith.constant 0 : i32
    return %c0_i32, %c0_i32_0, %c0_i32_1 : i32, i32, i32
  }
  func.func @transform_2(%arg0: i32, %arg1: i32) -> (i32, i32) {
    %c0_i32 = arith.constant 0 : i32
    %c0_i32_0 = arith.constant 0 : i32
    %c0_i32_1 = arith.constant 0 : i32
    return %c0_i32, %c0_i32_0 : i32, i32
  }
  func.func @transform_3(%arg0: i32, %arg1: i32) -> (i32, i32, i32, i32) {
    %c0_i32 = arith.constant 0 : i32
    %c0_i32_0 = arith.constant 0 : i32
    %c0_i32_1 = arith.constant 0 : i32
    return %arg0, %arg1, %c0_i32, %c0_i32_0 : i32, i32, i32, i32
  }
}

</mosaic_0001>

<bundles_post_ra>
// kernel: tpu_custom_call.1
= control target key start
LH: loop header
LB: loop body
LE: loop exit
PB: predicated region body
PF: predicated region fallthrough
CT: control target
= control target key end

     0   :  { %8 = vsyncpa [#allocation3], 0  ;;  %s1177_s0 = inlined_call_operand.vmem [shape: f32[2,1,18,72], index: 0, kind: input, shape index: {}]   ;;  %s1178_s1 = inlined_call_operand.hbm [shape: f32[3,72,128], index: 1, kind: input, shape index: {}]   ;;  %s1179_s2 = inlined_call_operand.vmem [shape: f32[1,128], index: 2, kind: input, shape index: {}]   ;;  %s1180_s3 = inlined_call_operand.hbm [shape: f32[2,1,16,128], index: 3, kind: output, shape index: {}]  }
   0x1   :  { %9 = vsyncpa [#allocation4], 0 }
   0x2   :  { %11 = vsyncpa [#allocation4 + $0x1], 0  ;;  %s1001_s12 = smov 0   ;;  %s1003_s13 = smov 0  }
   0x3   :  { %s1005_s14 = smov 0   ;;  %s1007_s15 = smov 0  }
   0x4   :  { %s1009_s16 = smov 0   ;;  %s1011_s17 = smov 0  }
   0x5 LB: > { %s622_s18 = sadd.s32 4294967295, %s973_s17   ;;  %s623_s19 = sadd.s32 4294967294, %s973_s17   ;;  %s973_s17 = sphi %s1011_s17, %s17_s17   ;;  %s969_s16 = sphi %s1009_s16, %s1198_s16   ;;  %s965_s15 = sphi %s1007_s15, %s1197_s15   ;;  %s961_s14 = sphi %s1005_s14, %s1196_s14   ;;  %s957_s13 = sphi %s1003_s13, %s1195_s13   ;;  %s953_s12 = sphi %s1001_s12, %s1194_s12  }
   0x6   : > { %s29_s20 = sadd.s32 1, %s969_s16  ;;  %s108_s21 = sadd.s32 1, %s961_s14 }
   0x7   : > { %p31_p0 = scmp.ge.s32.totalorder %s29_s20, 2  ;;  %p118_p1 = scmp.ne.s32.totalorder %s961_s14, %s957_s13 }
   0x8   : > { %p119_p2 = scmp.eq.s32.totalorder %s622_s18, 1  ;;  %p124_p3 = scmp.ne.s32.totalorder %s957_s13, %s953_s12 }
   0x9   : > { %s1200_s20 = smov (%p31_p0, %s29_s20), 0  ;;  %p125_p5 = scmp.eq.s32.totalorder %s623_s19, 1 }
   0xa   : > { %p1041_p4 = por %p119_p2, %p118_p1  ;;  %s103_s23 = ssub.s32 %s969_s16, %s1200_s20 }
   0xb   : > { %p624_p6 = scmp.ge.s32.totalorder %s973_s17, 1  ;;  %p106_p7 = scmp.eq.s32.totalorder %s103_s23, 0 }
   0xc   : > { %s1185_s22 = scalar_select %p1041_p4, 1, 0 }
   0xd   : > { %p1048_p8 = por %p125_p5, %p124_p3  ;;  %p132_p9 = scmp.lt.s32.totalorder %s973_s17, 3 }
   0xe   : > { %s1054_s25 = scalar_select %p106_p7, %s961_s14, %s108_s21  }
   0xf   : > { %s1186_s24 = scalar_select %p1048_p8, 1, 0 }
  0x10   : > { %p1056_p10 = pnand %p624_p6, %p132_p9  ;;  %p1060_p11 = scmp.eq.s32.totalorder %s622_s18, 0 }
  0x11   : > { %s975_s28 = smov [#allocation2]   ;;  %s863_s6 = scalar_lea.hbm %s1178_s1, 3456 }
  0x12   : > { %s1187_s26 = scalar_select %p1056_p10, 1, 0 }
  0x13   : > { %s1188_s27 = scalar_select %p1060_p11, 1, 0 }
  0x14   : > { %p799_p12 = pneg %p1056_p10  ;;  %s144_s29 = sshll.u32 %s975_s28, 4  ;;  %s145_s29 = int_to_ptr.vmem [resolvable:$true] %s144_s29 }
  0x15   : > { %p864_p0 = scmp.ne.s32.totalorder %s1178_s1, %s863_s6  ;;  %p870_p5 = scmp.lt.u32.totalorder %s863_s6, %s1178_s1 }
  0x16   : > { %p1068_p13 = pnand %p1060_p11, %p799_p12 }
  0x18   : > { %p865_p1 = pneg %p1068_p13 }
  0x1a   : > { %p866_p2 = pnand %p865_p1, %p864_p0 }
  0x1c   : > { %p867_p3 = pneg %p866_p2 }
  0x1e   : > { %p872_p6 = pnand %p870_p5, %p867_p3 }
  0x20   : > { %875 = shalt.err (!%p872_p6)
}
  0x21   : > { %s876_s11 = scalar_lea.vmem %s145_s29, 3456  ;;  %p884_p8 = scmp.lt.s32.totalorder %s145_s29, %s145_s29 }
  0x22   : > { %p877_p7 = scmp.ne.s32.totalorder %s145_s29, %s876_s11  ;;  %p885_p4 = scmp.lt.s32.totalorder %s876_s11, %s876_s11 }
  0x24   : > { %p879_p9 = pnand %p877_p7, %p865_p1  ;;  %p886_p11 = por %p885_p4, %p884_p8 }
  0x26   : > { %p880_p12 = pneg %p879_p9 }
  0x28   : > { %p887_p10 = pnand %p886_p11, %p880_p12 }
  0x2a   : > { %890 = shalt.err (!%p887_p10)
}
  0x2b   : > { %s976_s18 = smov 128   ;;  %s977_s19 = smov 8  }
  0x2c   : > { %802 = dma.hbm_to_vmem [thread:$0]  (!%p1068_p13), %s1178_s1, 3456, %s145_s29, [#allocation3], %s976_s18, %s976_s18, %s977_s19  }
  0x2d   : > { %p1190_p0 = scmp.ne.s32.totalorder %s1187_s26, 0 }
  0x2e   : > { %p1191_p2 = scmp.ne.s32.totalorder (!%p1190_p0), %s1188_s27, 0 }
  0x2f   : > { %175 = sbr.rel (%p1190_p0) target bundleno = 328 (0x148), region = 32 }
  0x36   : > { %944 = dma.done.wait (%p1191_p2), [#allocation3], 3456  }
  0x37   : > { %946 = vsyncadd (%p1191_p2), [#allocation3], 4294963840  ;;  %p203_p4 = scmp.lt.s32.totalorder %s965_s15, 1  ;;  %v215_v0 = vld [vmem:[#allocation2] sm:$0xff]  ;;  %v216_v1 = vld [vmem:[#allocation2 + $0x8] sm:$0xff]  ;;  %vm243_vm0 = vcmask 588800  }
  0x38   : > { %v217_v2 = vld [vmem:[#allocation2 + $0x10] sm:$0xff]  ;;  %v756_v3 = vpack.c.bf16 %v216_v1, %v215_v0  ;;  %v218_v4 = vld [vmem:[#allocation2 + $0x18] sm:$0xff]  ;;  %v219_v6 = vld [vmem:[#allocation2 + $0x20] sm:$0xff]  ;;  %vm237_vm1 = vcmask 1046528   ;;  %vm412_vm2 = vcmask 1045504   ;;  %s200_s26 = sand.u32 1, %s957_s13  }
  0x39   : > { %s204_s28 = scalar_select %p203_p4, %s965_s15, 1  ;;  %v760_v5 = vpack.c.bf16 %v218_v4, %v217_v2  ;;  %v220_v7 = vld [vmem:[#allocation2 + $0x28] sm:$0xff]  ;;  %v226_v9 = vld [vmem:[#allocation2 + $0x50] sm:$0xff]  ;;  %v227_v15 = vld [vmem:[#allocation2 + $0x58] sm:$0xff] }
  0x3a   : > { %757 = vmatprep.subr.bf16.mxu0 %v756_v3  ;;  %v225_v8 = vld [vmem:[#allocation2 + $0x48] sm:$0xff]  ;;  %v764_v13 = vpack.c.bf16 %v220_v7, %v219_v6  ;;  %v228_v16 = vld [vmem:[#allocation2 + $0x60] sm:$0xff]  ;;  %v221_v17 = vld [vmem:[#allocation2 + $0x30] sm:$0xff]  ;;  %s629_s27 = sshll.u32 %s200_s26, 4  ;;  %s643_s10 = sshll.u32 %s965_s15, 8 }
  0x3b   : > { %s792_s4 = smul.u32 24, %s204_s28  ;;  %759 = vmatpush3.bf16.msra.mxu0 %v756_v3  ;;  %v740_v11 = vpack.c.bf16 %v226_v9, %v225_v8  ;;  %v222_v18 = vld [vmem:[#allocation2 + $0x38] sm:$0xff]  ;;  %v744_v19 = vpack.c.bf16 %v228_v16, %v227_v15  ;;  %v229_v20 = vld [vmem:[#allocation2 + $0x68] sm:$0xff]  ;;  %v230_v22 = vld [vmem:[#allocation2 + $0x70] sm:$0xff]  ;;  %s202_s8 = scalar_lea.vmem [#allocation5], %s629_s27 }
  0x3c   : > { %761 = vmatprep.subr.bf16.mxu0 %v760_v5  ;;  %v748_v23 = vpack.c.bf16 %v230_v22, %v229_v20  ;;  %v768_v25 = vpack.c.bf16 %v222_v18, %v221_v17  ;;  %v231_v26 = vld [vmem:[#allocation2 + $0x78] sm:$0xff]  ;;  %v232_v27 = vld [vmem:[#allocation2 + $0x80] sm:$0xff]  ;;  %v403_v31 = vld [vmem:[#allocation2 + $0x90] sm:$0xff]  ;;  %s528_s9 = sshll.u32 %s202_s8, 4  ;;  %s1129_s19 = scalar_lea.hbm %s1180_s3, %s643_s10  ;;  %s1124_s9 = int_to_ptr.vmem [resolvable:$true] %s528_s9 }
  0x3d   : > { %s1099_s29 = scalar_lea.vmem %s1177_s0, %s792_s4  ;;  %741 = vmatprep.subr.bf16.mxu1 %v740_v11  ;;  %v752_v28 = vpack.c.bf16 %v232_v27, %v231_v26  ;;  %v223_v29 = vld [vmem:[#allocation2 + $0x40] sm:$0xff]  ;;  %v404_v32 = vld [vmem:[#allocation2 + $0x98] sm:$0xff]  ;;  %v406_v36 = vld [vmem:[#allocation2 + $0xa8] sm:$0xff]  ;;  %s1131_s21 = scalar_lea.sflag [#allocation4], %s200_s26 }
  0x3e   : > { %v212_v10 = vld [vmem:[%s1099_s29] sm:$0xff]  ;;  %v1104_v14 = vld [vmem:[%s1099_s29 + $0x8] sm:$0xff]  ;;  %743 = vmatpush3.bf16.msra.mxu1 %v740_v11  ;;  %v214_v30 = vld [vmem:[%s1099_s29 + $0x10] sm:$0x3]  ;;  %v772_v38 = vpack.c.bf16 %v404_v32, %v403_v31  ;;  %s891_s23 = scalar_lea.vmem %s1124_s9, 256  ;;  %p1192_p10 = scmp.ne.s32.totalorder %s1185_s22, 0 }
  0x3f   : > { %v238_v12 = vrot.slane %v212_v10, 1  ;;  %716 = vmatprep.mubr.msk.f32.mxu0 %vm243_vm0, %v212_v10  ;;  %v239_v21 = vrot.slane %v1104_v14, 1  ;;  %763 = vmatpush3.bf16.msra.mxu0 %v760_v5  ;;  %v413_v33 = vrot.slane %v212_v10, 2  ;;  %v414_v34 = vrot.slane %v1104_v14, 2  ;;  %v405_v35 = vld [vmem:[#allocation2 + $0xa0] sm:$0xff]  ;;  %v233_v39 = vld [vmem:[#allocation2 + $0x88] sm:$0xff]  ;;  %p892_p8 = scmp.ne.s32.totalorder %s1124_s9, %s891_s23 }
  0x40   : > { %745 = vmatprep.subr.bf16.mxu1 %v744_v19  ;;  %765 = vmatprep.subr.bf16.mxu0 %v764_v13  ;;  %v241_v37 = vrot.slane %v214_v30, 1  ;;  %v776_v40 = vpack.c.bf16 %v406_v36, %v405_v35  ;;  %v407_v42 = vld [vmem:[#allocation2 + $0xb0] sm:$0xff]  ;;  %v408_v43 = vld [vmem:[#allocation2 + $0xb8] sm:$0xff]  ;;  %v409_v46 = vld [vmem:[#allocation2 + $0xc0] sm:$0xff]  ;;  %v416_v49 = vrot.slane %v214_v30, 2  ;;  %s978_s15 = smov [#allocation5]  }
  0x41   : > { %v240_v24 = vsel %vm237_vm1, %v238_v12, %v239_v21  ;;  %v415_v41 = vsel %vm412_vm2, %v413_v33, %v414_v34  ;;  %v780_v45 = vpack.c.bf16 %v408_v43, %v407_v42  ;;  %v410_v47 = vld [vmem:[#allocation2 + $0xc8] sm:$0xff]  ;;  %v411_v50 = vld [vmem:[#allocation2 + $0xd0] sm:$0xff]  ;;  %p893_p11 = pnand %p892_p8, %p1192_p10  ;;  %s895_s28 = sshll.u32 %s978_s15, 4  ;;  %s896_s28 = int_to_ptr.vmem [resolvable:$false] %s895_s28 }
  0x42   : > { %695 = vmatprep.mubr.msk.f32.mxu1 %vm243_vm0, %v240_v24  ;;  %747 = vmatpush3.bf16.msra.mxu1 %v744_v19  ;;  %v242_v44 = vsel %vm237_vm1, %v239_v21, %v241_v37  ;;  %v784_v48 = vpack.c.bf16 %v410_v47, %v409_v46  ;;  %v417_v51 = vsel %vm412_vm2, %v414_v34, %v416_v49  ;;  %v637_v55 = vld [vmem:[%s1179_s2] ss:$0 sm:$0xff]  ;;  %s897_s4 = scalar_lea.vmem %s896_s28, 512  ;;  %p898_p1 = scmp.lt.s32.totalorder %s1124_s9, %s896_s28 }
  0x43   : > { %767 = vmatpush3.bf16.msra.mxu0 %v764_v13  ;;  %749 = vmatprep.subr.bf16.mxu1 %v748_v23  ;;  %p894_p13 = pneg %p893_p11  ;;  %p899_p3 = scmp.lt.s32.totalorder %s897_s4, %s891_s23 }
  0x44   : > { %769 = vmatprep.subr.bf16.mxu0 %v768_v25 }
  0x45   : > { %p900_p5 = por %p899_p3, %p898_p1 }
  0x46   : > { %751 = vmatpush3.bf16.msra.mxu1 %v748_v23 }
  0x47   : > { %771 = vmatpush3.bf16.msra.mxu0 %v768_v25  ;;  %753 = vmatprep.subr.bf16.mxu1 %v752_v28  ;;  %p901_p6 = pnand %p900_p5, %p894_p13 }
  0x48   : > { %714 = vmatprep.subr.mxu0 %v223_v29 }
  0x4a   : > { %755 = vmatpush3.bf16.msra.mxu1 %v752_v28 }
  0x4b   : > { %715 = vmatpush3.msra.mxu0 %v223_v29  ;;  %693 = vmatprep.subr.mxu1 %v233_v39 }
  0x4c   : > { %773 = vmatprep.subr.bf16.mxu0 %v772_v38  ;;  %717 = vmatmul.mubr.msk.f32.vlgmr.msra.gmra.mrb[0].mxu0 %vm243_vm0, %v1104_v14 }
  0x4d   : > { %775 = vmatpush3.bf16.msra.mxu0 %v772_v38  ;;  %737 = vmatprep.mubr.msk.f32.mxu0 %vm243_vm0, %v415_v41 }
  0x4e   : > { %777 = vmatprep.subr.bf16.mxu0 %v776_v40  ;;  %694 = vmatpush3.msra.mxu1 %v233_v39 }
  0x4f   : > { %696 = vmatmul.mubr.msk.f32.vlgmr.msra.gmra.mrb[0].mxu1 %vm243_vm0, %v242_v44 }
  0x51   : > { %779 = vmatpush3.bf16.msra.mxu0 %v776_v40 }
  0x52   : > { %781 = vmatprep.subr.bf16.mxu0 %v780_v45 }
  0x55   : > { %783 = vmatpush3.bf16.msra.mxu0 %v780_v45 }
  0x56   : > { %785 = vmatprep.subr.bf16.mxu0 %v784_v48 }
  0x59   : > { %787 = vmatpush3.bf16.msra.mxu0 %v784_v48 }
  0x5a   : > { %735 = vmatprep.subr.mxu0 %v411_v50 }
  0x5d   : > { %736 = vmatpush3.msra.mxu0 %v411_v50 }
  0x5e   : > { %738 = vmatmul.mubr.msk.f32.vlgmr.msra.gmra.mrb[0].mxu0 %vm243_vm0, %v417_v51 }
 0x122   : > { %v697_v52 = vpop.f32.mrb[0].mxu1 }
 0x123   : > { %v314_v53 = vpop.f32.mrb[1].mxu1 }
 0x131   : > { %v739_v54 = vpop.f32.mrb[0].mxu0 }
 0x132   : > { %v788_v56 = vadd.f32 %v739_v54, %v697_v52  ;;  %v488_v57 = vpop.f32.mrb[1].mxu0 }
 0x133   : > { %v789_v58 = vadd.f32 %v488_v57, %v314_v53 }
 0x134   : > { %v507_v59 = vadd.f32 %v788_v56, %v637_v55 }
 0x135   : > { %v506_v60 = vadd.f32 %v789_v58, %v637_v55 }
 0x136   : > { %v509_v61 = vmax.f32 %v507_v59, 0.0 }
 0x137   : > { %v508_v62 = vmax.f32 %v506_v60, 0.0 }
 0x138   : > { %511 = vst [vmem:[%s202_s8 + $0x8] sm:$0xff] %v509_v61 }
 0x139   : > { %510 = vst [vmem:[%s202_s8] sm:$0xff] %v508_v62 }
 0x13a   : > { %904 = shalt.err (!%p901_p6)
}
 0x13b   : > { %s905_s30 = scalar_lea.hbm %s1129_s19, 256  ;;  %s909_s26 = scalar_lea.hbm %s1180_s3, 512 }
 0x13c   : > { %p906_p7 = scmp.ne.s32.totalorder %s1129_s19, %s905_s30  ;;  %p910_p0 = scmp.lt.u32.totalorder %s1129_s19, %s1180_s3 }
 0x13d   : > { %p911_p2 = scmp.lt.u32.totalorder %s909_s26, %s905_s30  ;;  %p913_p8 = scmp.lt.u32.totalorder %s905_s30, %s1129_s19 }
 0x13e   : > { %p907_p9 = pnand %p906_p7, %p1192_p10 }
 0x13f   : > { %p912_p4 = por %p911_p2, %p910_p0 }
 0x140   : > { %p908_p12 = pneg %p907_p9 }
 0x141   : > { %p914_p11 = por %p913_p8, %p912_p4 }
 0x143   : > { %p915_p13 = pnand %p914_p11, %p908_p12 }
 0x145   : > { %918 = shalt.err (!%p915_p13)
}
 0x146   : > { %s979_s7 = smov 128   ;;  %s980_s8 = smov 8  }
 0x147   : > { %797 = dma.vmem_to_hbm [thread:$0]  (%p1192_p10), %s1124_s9, 256, %s1129_s19, %s1131_s21, %s979_s7, %s979_s7, %s980_s8  }
 0x148 PF: > { %p809_p1 = scmp.ge.s32.totalorder %s973_s17, 2  ;;  %s543_s10 = sand.u32 1, %s953_s12  }
 0x149   : > { %p1193_p3 = scmp.ne.s32.totalorder %s1186_s24, 0  ;;  %s544_s11 = scalar_lea.sflag [#allocation4], %s543_s10 }
 0x14b   : > { %p804_p5 = pnand %p809_p1, %p1193_p3 }
 0x14d   : > { %948 = dma.done.wait (!%p804_p5), %s544_s11, 256  }
 0x14e   : > { %950 = vsyncadd (!%p804_p5), %s544_s11, 4294967040  ;;  %s17_s17 = sadd.s32 1, %s973_s17   ;;  %s1194_s12 = smov %s957_s13 }
 0x14f   : > { %p14_p6 = scmp.ge.s32.totalorder %s17_s17, 4   ;;  %s1195_s13 = smov %s961_s14 }
 0x150   : > { %s1196_s14 = smov %s1054_s25  ;;  %s1197_s15 = smov %s969_s16 }
 0x151   : > { %s1198_s16 = smov %s1200_s20  ;;  %16 = sbr.rel (!%p14_p6) target bundleno = 5 (0x5), region = 74 }
 0x158   :  { %549 = vsyncpa [#allocation3], 1 }
 0x159   :  { %551 = vsyncpa [#allocation3 + $0x1], 1 }
 0x15a   :  { %552 = vsyncpa [#allocation4], 1 }
 0x15b   :  { %554 = vsyncpa [#allocation4 + $0x1], 1 }

</bundles_post_ra>
